<compile_context>
chip_gen: v6e
topology: v6e:2x2x1
jax: 0.10.0
libtpu: 0.0.40
codegen_flags: <defaults>
</compile_context>

<pallas_src>
import jax
import jax.numpy as jnp
from jax.experimental import pallas as pl
from jax.experimental.pallas import tpu as pltpu


# ----------------------------------------------------------------------------
# Kernel
# ----------------------------------------------------------------------------
def critic_mlp_kernel(state_ref, act_ref, w1s_ref, w1a_ref, w2_ref, aux_ref,
                      out_ref):
    """Fused 3-layer MLP on one batch tile, computed with batch on lanes.

    state_ref: [TB, S]   batch-major input tile (as stored in HBM)
    act_ref:   [TB, A]
    w1s_ref:   [H, S]    layer-1 weight, state half   (nn.Linear (out,in) layout)
    w1a_ref:   [H, A]    layer-1 weight, actions half
    w2_ref:    [H, H]    layer-2 weight
    aux_ref:   [H, 4]    packed small params: columns = (b1, b2, w3, b3)
    out_ref:   [1, TB]   lane-dense q row
    """
    # Contract over the feature axis of both operands ("w @ x.T" without an
    # explicit transpose): (H, K) x (TB, K) -> (H, TB).
    dn_trans_b = (((1,), (1,)), ((), ()))

    # Layer 1: concat fused as a split matmul, emitted directly as (H, TB).
    h1 = (jax.lax.dot_general(w1s_ref[...], state_ref[...], dn_trans_b,
                              preferred_element_type=jnp.float32)
          + jax.lax.dot_general(w1a_ref[...], act_ref[...], dn_trans_b,
                                preferred_element_type=jnp.float32)
          + aux_ref[:, 0:1])                                   # + b1 (H,1)
    h1 = jnp.maximum(h1, 0.0)                                  # ReLU

    # Layer 2: (H, H) @ (H, TB) -> (H, TB).
    h2 = (jnp.dot(w2_ref[...], h1, preferred_element_type=jnp.float32)
          + aux_ref[:, 1:2])                                   # + b2 (H,1)
    h2 = jnp.maximum(h2, 0.0)                                  # ReLU

    # Layer 3 (H -> 1): VPU multiply + XLU sublane reduce -> (1, TB), + b3.
    # (MXU would also work on v7x's MRB, but both slots have slack.)
    out_ref[...] = (jnp.sum(h2 * aux_ref[:, 2:3], axis=0, keepdims=True)
                    + aux_ref[0:1, 3:4])


# ----------------------------------------------------------------------------
# Wrapper
# ----------------------------------------------------------------------------
def _tensorcores_per_chip():
    """1 TC/chip on v5e/v6e, 2 on v7x.  Defaults to 1 if detection fails."""
    try:
        kind = jax.devices()[0].device_kind.lower()
        if "v7" in kind:
            return 2
    except Exception:
        pass
    return 1


def critic_forward(state, actions, params, *, num_cores=None):
    """Run the fused critic MLP.  Returns q of shape (B, 1)."""
    w1s_t, w1a_t, w2_t, aux = params
    B, S = state.shape
    A = actions.shape[1]
    H = w2_t.shape[0]

    if num_cores is None:
        num_cores = _tensorcores_per_chip()

    # One grid step per TensorCore; the whole batch in one tile otherwise.
    tile = pl.cdiv(B, num_cores)
    if tile < B:
        # Multi-step grid: keep output blocks lane-dense / (8,128)-legal.
        tile = pl.cdiv(tile, 128) * 128
        if tile >= B:
            tile = B
    grid_b = pl.cdiv(B, tile)

    const = lambda i: (0, 0)   # parameters stay VMEM-resident across steps

    q_row = pl.pallas_call(
        critic_mlp_kernel,
        out_shape=jax.ShapeDtypeStruct((1, B), jnp.float32),
        grid=(grid_b,),
        in_specs=[
            pl.BlockSpec((tile, S), lambda i: (i, 0)),   # state tile
            pl.BlockSpec((tile, A), lambda i: (i, 0)),   # actions tile
            pl.BlockSpec((H, S), const),                 # W1 (state half)
            pl.BlockSpec((H, A), const),                 # W1 (actions half)
            pl.BlockSpec((H, H), const),                 # W2
            pl.BlockSpec((H, 4), const),                 # packed b1|b2|w3|b3
        ],
        out_specs=pl.BlockSpec((1, tile), lambda i: (0, i)),
        compiler_params=pltpu.CompilerParams(
            dimension_semantics=("parallel",)),
    )(state, actions, w1s_t, w1a_t, w2_t, aux)

    # Any out-of-range tail columns were already discarded by Pallas; the
    # output is exactly (1, B), so no consumer can ever see padded rows.
    return q_row.reshape(B, 1)


# ----------------------------------------------------------------------------
# Parameters (PyTorch nn.Linear layout) + host-side packing for the kernel
# ----------------------------------------------------------------------------
def init_params(key, input_state, input_actions, hidden):
    """Deterministic synthetic parameters in the nn.Linear (out, in) layout."""
    d_in = input_state + input_actions
    ks = jax.random.split(key, 6)

    def u(k, shape, fan_in):
        bound = 1.0 / (fan_in ** 0.5)
        return jax.random.uniform(k, shape, jnp.float32, -bound, bound)

    w1 = u(ks[0], (hidden, d_in), d_in)      # [H, S+A]
    b1 = u(ks[1], (hidden,), d_in)           # [H]
    w2 = u(ks[2], (hidden, hidden), hidden)  # [H, H]
    b2 = u(ks[3], (hidden,), hidden)         # [H]
    w3 = u(ks[4], (1, hidden), hidden)       # [1, H]
    b3 = u(ks[5], (1,), hidden)              # [1]
    return (w1, b1, w2, b2, w3, b3)


def pack_params(raw, input_state):
    """Split W1 (fused concat) and pack the four tiny params into one (H,4)."""
    w1, b1, w2, b2, w3, b3 = raw
    w1s_t = w1[:, :input_state]              # [H, S]
    w1a_t = w1[:, input_state:]              # [H, A]
    aux = jnp.stack(
        [b1, b2, w3[0], jnp.full_like(b1, b3[0])], axis=1)   # [H, 4]
    # TODO(synk): optionally fold w1s_t/w1a_t/w2 into one lane-padded operand
    # to cut parameter DMAs from 4 to 2; marginal at this size.
    return (w1s_t, w1a_t, w2, aux)


def critic_forward_ref(state, actions, raw):
    """Plain-JAX reference: exact PyTorch CriticNN.forward semantics."""
    w1, b1, w2, b2, w3, b3 = raw
    x = jnp.concatenate([state, actions], axis=1)
    h1 = jnp.maximum(x @ w1.T + b1, 0.0)
    h2 = jnp.maximum(h1 @ w2.T + b2, 0.0)
    return h2 @ w3.T + b3                    # (B, 1)


# ----------------------------------------------------------------------------
# Demo / self-check
# ----------------------------------------------------------------------------
if __name__ == "__main__":
    # CriticNN-consistent feature dims (state=16, actions=4, hidden=32);
    # batch=256 so the per-core tiling (1 step on v5e/v6e, 2 on v7x) is real.
    B, S, A, H = 256, 16, 4, 32

    key = jax.random.PRNGKey(0)
    k_state, k_act, k_params = jax.random.split(key, 3)

    state = jax.random.normal(k_state, (B, S), dtype=jnp.float32)
    actions = jax.random.normal(k_act, (B, A), dtype=jnp.float32)

    raw_params = init_params(k_params, S, A, H)
    params = pack_params(raw_params, S)

    q = critic_forward(state, actions, params)
    jax.block_until_ready(q)

    q_ref = critic_forward_ref(state, actions, raw_params)
    assert q.shape == (B, 1)
    assert jnp.allclose(q, q_ref, atol=1e-4, rtol=1e-4), "mismatch vs JAX ref"

    print("KERNEL_OK")
</pallas_src>

<mosaic_0001>
module attributes {stable_mosaic.version = 11 : i64} {
  func.func @critic_mlp_kernel(%arg0: i32, %arg1: memref<256x16xf32, #tpu.memory_space<vmem>>, %arg2: memref<256x4xf32, #tpu.memory_space<vmem>>, %arg3: memref<32x16xf32, #tpu.memory_space<vmem>>, %arg4: memref<32x4xf32, #tpu.memory_space<vmem>>, %arg5: memref<32x32xf32, #tpu.memory_space<vmem>>, %arg6: memref<32x4xf32, #tpu.memory_space<vmem>>, %arg7: memref<1x256xf32, #tpu.memory_space<vmem>>) attributes {dimension_semantics = [#tpu.dimension_semantics<parallel>], iteration_bounds = array<i64: 1>, scalar_prefetch = 0 : i64, scratch_operands = 0 : i64, tpu.core_type = #tpu.core_type<tc>, window_params = [{transform_indices = @transform_0, window_bounds = array<i64: 256, 16>}, {transform_indices = @transform_1, window_bounds = array<i64: 256, 4>}, {pipeline_mode = #tpu.pipeline_mode<synchronous>, transform_indices = @transform_2, window_bounds = array<i64: 32, 16>}, {pipeline_mode = #tpu.pipeline_mode<synchronous>, transform_indices = @transform_3, window_bounds = array<i64: 32, 4>}, {pipeline_mode = #tpu.pipeline_mode<synchronous>, transform_indices = @transform_4, window_bounds = array<i64: 32, 32>}, {pipeline_mode = #tpu.pipeline_mode<synchronous>, transform_indices = @transform_5, window_bounds = array<i64: 32, 4>}, {transform_indices = @transform_6, window_bounds = array<i64: 1, 256>}]} {
    %c0 = arith.constant 0 : index
    %c0_0 = arith.constant 0 : index
    %0 = vector.load %arg3[%c0, %c0_0] : memref<32x16xf32, #tpu.memory_space<vmem>>, vector<32x16xf32>
    %c0_1 = arith.constant 0 : index
    %c0_2 = arith.constant 0 : index
    %1 = vector.load %arg1[%c0_1, %c0_2] : memref<256x16xf32, #tpu.memory_space<vmem>>, vector<256x16xf32>
    %cst = arith.constant dense<0.000000e+00> : vector<32x256xf32>
    %2 = tpu.matmul %0, %1, %cst {dimension_numbers = #tpu.dot_dimension_numbers<[1], [1], [0], [0], [0, 0, 1, 0], [], []>} : vector<32x16xf32>, vector<256x16xf32>, vector<32x256xf32> -> vector<32x256xf32>
    %c0_3 = arith.constant 0 : index
    %c0_4 = arith.constant 0 : index
    %3 = vector.load %arg4[%c0_3, %c0_4] : memref<32x4xf32, #tpu.memory_space<vmem>>, vector<32x4xf32>
    %c0_5 = arith.constant 0 : index
    %c0_6 = arith.constant 0 : index
    %4 = vector.load %arg2[%c0_5, %c0_6] : memref<256x4xf32, #tpu.memory_space<vmem>>, vector<256x4xf32>
    %cst_7 = arith.constant dense<0.000000e+00> : vector<32x256xf32>
    %5 = tpu.matmul %3, %4, %cst_7 {dimension_numbers = #tpu.dot_dimension_numbers<[1], [1], [0], [0], [0, 0, 1, 0], [], []>} : vector<32x4xf32>, vector<256x4xf32>, vector<32x256xf32> -> vector<32x256xf32>
    %6 = arith.addf %2, %5 : vector<32x256xf32>
    %c0_8 = arith.constant 0 : index
    %c0_9 = arith.constant 0 : index
    %7 = vector.load %arg6[%c0_8, %c0_9] : memref<32x4xf32, #tpu.memory_space<vmem>>, vector<32x1xf32>
    %8 = vector.broadcast %7 : vector<32x1xf32> to vector<32x256xf32>
    %9 = arith.addf %6, %8 : vector<32x256xf32>
    %cst_10 = arith.constant 0.000000e+00 : f32
    %10 = vector.broadcast %cst_10 : f32 to vector<32x256xf32>
    %11 = arith.maximumf %9, %10 : vector<32x256xf32>
    %c0_11 = arith.constant 0 : index
    %c0_12 = arith.constant 0 : index
    %12 = vector.load %arg5[%c0_11, %c0_12] : memref<32x32xf32, #tpu.memory_space<vmem>>, vector<32x32xf32>
    %cst_13 = arith.constant dense<0.000000e+00> : vector<32x256xf32>
    %13 = tpu.matmul %12, %11, %cst_13 {dimension_numbers = #tpu.dot_dimension_numbers<[1], [0], [0], [1], [0, 0, 1, 1], [], []>} : vector<32x32xf32>, vector<32x256xf32>, vector<32x256xf32> -> vector<32x256xf32>
    %c0_14 = arith.constant 0 : index
    %c1 = arith.constant 1 : index
    %14 = vector.load %arg6[%c0_14, %c1] : memref<32x4xf32, #tpu.memory_space<vmem>>, vector<32x1xf32>
    %15 = vector.broadcast %14 : vector<32x1xf32> to vector<32x256xf32>
    %16 = arith.addf %13, %15 : vector<32x256xf32>
    %cst_15 = arith.constant 0.000000e+00 : f32
    %17 = vector.broadcast %cst_15 : f32 to vector<32x256xf32>
    %18 = arith.maximumf %16, %17 : vector<32x256xf32>
    %c0_16 = arith.constant 0 : index
    %c2 = arith.constant 2 : index
    %19 = vector.load %arg6[%c0_16, %c2] : memref<32x4xf32, #tpu.memory_space<vmem>>, vector<32x1xf32>
    %20 = vector.broadcast %19 : vector<32x1xf32> to vector<32x256xf32>
    %21 = arith.mulf %18, %20 : vector<32x256xf32>
    %cst_17 = arith.constant dense<0.000000e+00> : vector<256xf32>
    %22 = vector.multi_reduction <add>, %21, %cst_17 [0] : vector<32x256xf32> to vector<256xf32>
    %23 = vector.shape_cast %22 : vector<256xf32> to vector<1x256xf32>
    %c0_18 = arith.constant 0 : index
    %c3 = arith.constant 3 : index
    %24 = vector.load %arg6[%c0_18, %c3] : memref<32x4xf32, #tpu.memory_space<vmem>>, vector<1x1xf32>
    %25 = vector.broadcast %24 : vector<1x1xf32> to vector<1x256xf32>
    %26 = arith.addf %23, %25 : vector<1x256xf32>
    %c0_19 = arith.constant 0 : index
    %c0_20 = arith.constant 0 : index
    %27 = vector.load %arg7[%c0_19, %c0_20] : memref<1x256xf32, #tpu.memory_space<vmem>>, vector<1x256xf32>
    tpu.vector_store %arg7[%c0_19, %c0_20], %26 {strides = array<i32>} : memref<1x256xf32, #tpu.memory_space<vmem>>, vector<1x256xf32>,
    return
  }
  func.func @transform_0(%arg0: i32) -> (i32, i32) {
    %c0_i32 = arith.constant 0 : i32
    %c0_i32_0 = arith.constant 0 : i32
    return %arg0, %c0_i32 : i32, i32
  }
  func.func @transform_1(%arg0: i32) -> (i32, i32) {
    %c0_i32 = arith.constant 0 : i32
    %c0_i32_0 = arith.constant 0 : i32
    return %arg0, %c0_i32 : i32, i32
  }
  func.func @transform_2(%arg0: i32) -> (i32, i32) {
    %c0_i32 = arith.constant 0 : i32
    %c0_i32_0 = arith.constant 0 : i32
    %c0_i32_1 = arith.constant 0 : i32
    return %c0_i32, %c0_i32_0 : i32, i32
  }
  func.func @transform_3(%arg0: i32) -> (i32, i32) {
    %c0_i32 = arith.constant 0 : i32
    %c0_i32_0 = arith.constant 0 : i32
    %c0_i32_1 = arith.constant 0 : i32
    return %c0_i32, %c0_i32_0 : i32, i32
  }
  func.func @transform_4(%arg0: i32) -> (i32, i32) {
    %c0_i32 = arith.constant 0 : i32
    %c0_i32_0 = arith.constant 0 : i32
    %c0_i32_1 = arith.constant 0 : i32
    return %c0_i32, %c0_i32_0 : i32, i32
  }
  func.func @transform_5(%arg0: i32) -> (i32, i32) {
    %c0_i32 = arith.constant 0 : i32
    %c0_i32_0 = arith.constant 0 : i32
    %c0_i32_1 = arith.constant 0 : i32
    return %c0_i32, %c0_i32_0 : i32, i32
  }
  func.func @transform_6(%arg0: i32) -> (i32, i32) {
    %c0_i32 = arith.constant 0 : i32
    %c0_i32_0 = arith.constant 0 : i32
    return %c0_i32, %arg0 : i32, i32
  }
}

</mosaic_0001>

<bundles_post_ra>
// kernel: tpu_custom_call.1
= control target key start
LH: loop header
LB: loop body
LE: loop exit
PB: predicated region body
PF: predicated region fallthrough
CT: control target
= control target key end

     0   :  { %vm96_vm0 = vcmask 31744   ;;  %vm294_vm1 = vcmask 130048   ;;  %v949_v10 = vmov 0   ;;  %s1349_s0 = inlined_call_operand.vmem [shape: f32[256,16], index: 0, kind: input, shape index: {}]   ;;  %s1350_s1 = inlined_call_operand.vmem [shape: f32[256,4], index: 1, kind: input, shape index: {}]   ;;  %s1351_s2 = inlined_call_operand.vmem [shape: f32[32,16], index: 2, kind: input, shape index: {}]   ;;  %s1352_s3 = inlined_call_operand.vmem [shape: f32[32,4], index: 3, kind: input, shape index: {}]   ;;  %s1353_s4 = inlined_call_operand.vmem [shape: f32[32,32], index: 4, kind: input, shape index: {}]   ;;  %s1354_s5 = inlined_call_operand.vmem [shape: f32[32,4], index: 5, kind: input, shape index: {}]   ;;  %s1355_s6 = inlined_call_operand.hbm [shape: f32[1,256], index: 6, kind: output, shape index: {}]  }
   0x1   :  { %v95_v0 = vld [vmem:[%s1350_s1 + $0xf8] sm:$0xff]  ;;  %v94_v4 = vld [vmem:[%s1350_s1 + $0xf0] sm:$0xff]  ;;  %v93_v8 = vld [vmem:[%s1350_s1 + $0xe8] sm:$0xff]  ;;  %921 = vset.pattern.permute.xlu1 %v949_v10  ;;  %920 = vset.pattern.permute.xlu0 %v949_v10 }
   0x2   :  { %v59_v1 = vld [vmem:[%s1349_s0 + $0xf8] sm:$0xff]  ;;  %825 = vmatprep.subr.msk.mxu0 %vm96_vm0, %v95_v0  ;;  %v58_v5 = vld [vmem:[%s1349_s0 + $0xf0] sm:$0xff]  ;;  %v57_v9 = vld [vmem:[%s1349_s0 + $0xe8] sm:$0xff] }
   0x3   :  { %v79_v2 = vld [vmem:[%s1350_s1 + $0x78] sm:$0xff]  ;;  %865 = vmatprep.subr.msk.mxu1 %vm294_vm1, %v59_v1  ;;  %v78_v6 = vld [vmem:[%s1350_s1 + $0x70] sm:$0xff]  ;;  %v77_v11 = vld [vmem:[%s1350_s1 + $0x68] sm:$0xff] }
   0x4   :  { %v43_v3 = vld [vmem:[%s1349_s0 + $0x78] sm:$0xff]  ;;  %826 = vmatpush3.xpose.msk.msra.mxu0 %vm96_vm0, %v79_v2  ;;  %v42_v7 = vld [vmem:[%s1349_s0 + $0x70] sm:$0xff]  ;;  %v41_v12 = vld [vmem:[%s1349_s0 + $0x68] sm:$0xff] }
   0x5   :  { %866 = vmatpush3.xpose.msk.msra.mxu1 %vm294_vm1, %v43_v3  ;;  %827 = vmatprep.subr.msk.mxu0 %vm96_vm0, %v94_v4  ;;  %v92_v13 = vld [vmem:[%s1350_s1 + $0xe0] sm:$0xff]  ;;  %v91_v17 = vld [vmem:[%s1350_s1 + $0xd8] sm:$0xff]  ;;  %v90_v21 = vld [vmem:[%s1350_s1 + $0xd0] sm:$0xff] }
   0x6   :  { %867 = vmatprep.subr.msk.mxu1 %vm294_vm1, %v58_v5  ;;  %v56_v14 = vld [vmem:[%s1349_s0 + $0xe0] sm:$0xff]  ;;  %v55_v18 = vld [vmem:[%s1349_s0 + $0xd8] sm:$0xff]  ;;  %v54_v22 = vld [vmem:[%s1349_s0 + $0xd0] sm:$0xff] }
   0x7   :  { %v76_v15 = vld [vmem:[%s1350_s1 + $0x60] sm:$0xff]  ;;  %v75_v19 = vld [vmem:[%s1350_s1 + $0x58] sm:$0xff]  ;;  %v74_v23 = vld [vmem:[%s1350_s1 + $0x50] sm:$0xff] }
   0x8   :  { %828 = vmatpush3.xpose.msk.msra.mxu0 %vm96_vm0, %v78_v6  ;;  %v40_v16 = vld [vmem:[%s1349_s0 + $0x60] sm:$0xff]  ;;  %v39_v20 = vld [vmem:[%s1349_s0 + $0x58] sm:$0xff]  ;;  %v38_v24 = vld [vmem:[%s1349_s0 + $0x50] sm:$0xff] }
   0x9   :  { %868 = vmatpush3.xpose.msk.msra.mxu1 %vm294_vm1, %v42_v7  ;;  %829 = vmatprep.subr.msk.mxu0 %vm96_vm0, %v93_v8  ;;  %v89_v25 = vld [vmem:[%s1350_s1 + $0xc8] sm:$0xff]  ;;  %v1094_v27 = vld [vmem:[%s1352_s3] sm:$0xff]  ;;  %v1129_v34 = vld [vmem:[%s1354_s5 + $0x18] sm:$0xff] }
   0xa   :  { %869 = vmatprep.subr.msk.mxu1 %vm294_vm1, %v57_v9  ;;  %v53_v26 = vld [vmem:[%s1349_s0 + $0xc8] sm:$0xff]  ;;  %v1099_v28 = vld [vmem:[%s1351_s2] sm:$0xff]  ;;  %857 = vmatprep.mubr.msk.f32.mxu0 %vm96_vm0, %v1094_v27 }
   0xb   :  { %v73_v29 = vld [vmem:[%s1350_s1 + $0x48] sm:$0xff]  ;;  %v88_v31 = vld [vmem:[%s1350_s1 + $0xc0] sm:$0xff]  ;;  %897 = vmatprep.mubr.msk.f32.mxu1 %vm294_vm1, %v1099_v28  ;;  %513 = vperm.xlu0 %920, %v1129_v34  }
   0xc   :  { %830 = vmatpush3.xpose.msk.msra.mxu0 %vm96_vm0, %v77_v11  ;;  %v37_v30 = vld [vmem:[%s1349_s0 + $0x48] sm:$0xff]  ;;  %v52_v32 = vld [vmem:[%s1349_s0 + $0xc0] sm:$0xff] }
   0xd   :  { %870 = vmatpush3.xpose.msk.msra.mxu1 %vm294_vm1, %v41_v12  ;;  %831 = vmatprep.subr.msk.mxu0 %vm96_vm0, %v92_v13  ;;  %v1124_v33 = vld [vmem:[%s1354_s5 + $0x8] sm:$0xff] }
   0xe   :  { %871 = vmatprep.subr.msk.mxu1 %vm294_vm1, %v56_v14  ;;  %503 = vperm.xlu1 %921, %v1124_v33  }
  0x10   :  { %832 = vmatpush3.xpose.msk.msra.mxu0 %vm96_vm0, %v76_v15 }
  0x11   :  { %872 = vmatpush3.xpose.msk.msra.mxu1 %vm294_vm1, %v40_v16  ;;  %833 = vmatprep.subr.msk.mxu0 %vm96_vm0, %v91_v17 }
  0x12   :  { %873 = vmatprep.subr.msk.mxu1 %vm294_vm1, %v55_v18 }
  0x14   :  { %834 = vmatpush3.xpose.msk.msra.mxu0 %vm96_vm0, %v75_v19 }
  0x15   :  { %874 = vmatpush3.xpose.msk.msra.mxu1 %vm294_vm1, %v39_v20  ;;  %835 = vmatprep.subr.msk.mxu0 %vm96_vm0, %v90_v21 }
  0x16   :  { %875 = vmatprep.subr.msk.mxu1 %vm294_vm1, %v54_v22 }
  0x18   :  { %836 = vmatpush3.xpose.msk.msra.mxu0 %vm96_vm0, %v74_v23 }
  0x19   :  { %876 = vmatpush3.xpose.msk.msra.mxu1 %vm294_vm1, %v38_v24  ;;  %837 = vmatprep.subr.msk.mxu0 %vm96_vm0, %v89_v25 }
  0x1a   :  { %877 = vmatprep.subr.msk.mxu1 %vm294_vm1, %v53_v26 }
  0x1b   :  { %11 = vsyncpa [#allocation3], 0  ;;  %v1138_v35 = vld [vmem:[%s1354_s5] sm:$0xff]  ;;  %v1143_v36 = vld [vmem:[%s1354_s5 + $0x10] sm:$0xff]  ;;  %v950_v13 = vmov 0.0   ;;  %v951_v14 = vmov 1  }
  0x1c   :  { %838 = vmatpush3.xpose.msk.msra.mxu0 %vm96_vm0, %v73_v29  ;;  %v72_v37 = vld [vmem:[%s1350_s1 + $0x40] sm:$0xff]  ;;  %v87_v39 = vld [vmem:[%s1350_s1 + $0xb8] sm:$0xff]  ;;  %498 = vperm.xlu1 %921, %v1138_v35   ;;  %v86_v43 = vld [vmem:[%s1350_s1 + $0xb0] sm:$0xff]  ;;  %v952_v15 = vmov 2   ;;  %v953_v17 = vmov 3   ;;  %vm552_vm2 = vcmask 261120  }
  0x1d   :  { %878 = vmatpush3.xpose.msk.msra.mxu1 %vm294_vm1, %v37_v30  ;;  %839 = vmatprep.subr.msk.mxu0 %vm96_vm0, %v88_v31  ;;  %v36_v38 = vld [vmem:[%s1349_s0 + $0x40] sm:$0xff]  ;;  %v51_v40 = vld [vmem:[%s1349_s0 + $0xb8] sm:$0xff]  ;;  %v50_v44 = vld [vmem:[%s1349_s0 + $0xb0] sm:$0xff] }
  0x1e   :  { %879 = vmatprep.subr.msk.mxu1 %vm294_vm1, %v52_v32  ;;  %508 = vperm.xlu0 %920, %v1143_v36   ;;  %v71_v41 = vld [vmem:[%s1350_s1 + $0x38] sm:$0xff]  ;;  %v70_v45 = vld [vmem:[%s1350_s1 + $0x30] sm:$0xff]  ;;  %v85_v47 = vld [vmem:[%s1350_s1 + $0xa8] sm:$0xff] }
  0x1f   :  { %v35_v42 = vld [vmem:[%s1349_s0 + $0x38] sm:$0xff]  ;;  %v34_v46 = vld [vmem:[%s1349_s0 + $0x30] sm:$0xff]  ;;  %v49_v48 = vld [vmem:[%s1349_s0 + $0xa8] sm:$0xff] }
  0x20   :  { %840 = vmatpush3.xpose.msk.msra.mxu0 %vm96_vm0, %v72_v37  ;;  %v69_v49 = vld [vmem:[%s1350_s1 + $0x28] sm:$0xff]  ;;  %v84_v51 = vld [vmem:[%s1350_s1 + $0xa0] sm:$0xff]  ;;  %v83_v55 = vld [vmem:[%s1350_s1 + $0x98] sm:$0xff]  ;;  %923 = vset.pattern.permute.xlu1 %v951_v14 }
  0x21   :  { %880 = vmatpush3.xpose.msk.msra.mxu1 %vm294_vm1, %v36_v38  ;;  %841 = vmatprep.subr.msk.mxu0 %vm96_vm0, %v87_v39  ;;  %v33_v50 = vld [vmem:[%s1349_s0 + $0x28] sm:$0xff]  ;;  %v48_v52 = vld [vmem:[%s1349_s0 + $0xa0] sm:$0xff]  ;;  %v47_v56 = vld [vmem:[%s1349_s0 + $0x98] sm:$0xff] }
  0x22   :  { %881 = vmatprep.subr.msk.mxu1 %vm294_vm1, %v51_v40  ;;  %v68_v53 = vld [vmem:[%s1350_s1 + $0x20] sm:$0xff]  ;;  %v67_v57 = vld [vmem:[%s1350_s1 + $0x18] sm:$0xff]  ;;  %v82_v59 = vld [vmem:[%s1350_s1 + $0x90] sm:$0xff]  ;;  %922 = vset.pattern.permute.xlu0 %v951_v14 }
  0x23   :  { %v32_v54 = vld [vmem:[%s1349_s0 + $0x20] sm:$0xff]  ;;  %v31_v58 = vld [vmem:[%s1349_s0 + $0x18] sm:$0xff]  ;;  %v46_v60 = vld [vmem:[%s1349_s0 + $0x90] sm:$0xff]  ;;  %541 = vperm.xlu1 %923, %v1124_v33   ;;  %537 = vperm.xlu0 %922, %v1138_v35  }
  0x24   :  { %842 = vmatpush3.xpose.msk.msra.mxu0 %vm96_vm0, %v71_v41  ;;  %v66_v61 = vld [vmem:[%s1350_s1 + $0x10] sm:$0xff]  ;;  %v81_v63 = vld [vmem:[%s1350_s1 + $0x88] sm:$0xff]  ;;  %v80_v3 = vld [vmem:[%s1350_s1 + $0x80] sm:$0xff] }
  0x25   :  { %882 = vmatpush3.xpose.msk.msra.mxu1 %vm294_vm1, %v35_v42  ;;  %843 = vmatprep.subr.msk.mxu0 %vm96_vm0, %v86_v43  ;;  %v30_v62 = vld [vmem:[%s1349_s0 + $0x10] sm:$0xff]  ;;  %v45_v0 = vld [vmem:[%s1349_s0 + $0x88] sm:$0xff]  ;;  %v44_v4 = vld [vmem:[%s1349_s0 + $0x80] sm:$0xff] }
  0x26   :  { %883 = vmatprep.subr.msk.mxu1 %vm294_vm1, %v50_v44  ;;  %v65_v1 = vld [vmem:[%s1350_s1 + $0x8] sm:$0xff]  ;;  %v64_v5 = vld [vmem:[%s1350_s1] sm:$0xff]  ;;  %v62_v9 = vld [vmem:[%s1352_s3 + $0x10] sm:$0xff] }
  0x27   :  { %v29_v2 = vld [vmem:[%s1349_s0 + $0x8] sm:$0xff]  ;;  %v28_v6 = vld [vmem:[%s1349_s0] sm:$0xff]  ;;  %v26_v10 = vld [vmem:[%s1351_s2 + $0x10] sm:$0xff]  ;;  %545 = vperm.xlu1 %923, %v1143_v36   ;;  %549 = vperm.xlu0 %922, %v1129_v34  }
  0x28   :  { %844 = vmatpush3.xpose.msk.msra.mxu0 %vm96_vm0, %v70_v45  ;;  %v61_v7 = vld [vmem:[%s1352_s3 + $0x8] sm:$0xff]  ;;  %v63_v11 = vld [vmem:[%s1352_s3 + $0x18] sm:$0xff]  ;;  %v704_v16 = vld [vmem:[%s1354_s5] sm:$0x1] }
  0x29   :  { %884 = vmatpush3.xpose.msk.msra.mxu1 %vm294_vm1, %v34_v46  ;;  %845 = vmatprep.subr.msk.mxu0 %vm96_vm0, %v85_v47  ;;  %v25_v8 = vld [vmem:[%s1351_s2 + $0x8] sm:$0xff]  ;;  %v27_v12 = vld [vmem:[%s1351_s2 + $0x18] sm:$0xff] }
  0x2a   :  { %885 = vmatprep.subr.msk.mxu1 %vm294_vm1, %v49_v48 }
  0x2b   :  { %924 = vset.pattern.permute.xlu1 %v952_v15  ;;  %925 = vset.pattern.permute.xlu0 %v952_v15 }
  0x2c   :  { %846 = vmatpush3.xpose.msk.msra.mxu0 %vm96_vm0, %v69_v49  ;;  %663 = vperm.xlu1 %924, %v1138_v35  }
  0x2d   :  { %886 = vmatpush3.xpose.msk.msra.mxu1 %vm294_vm1, %v33_v50  ;;  %847 = vmatprep.subr.msk.mxu0 %vm96_vm0, %v84_v51 }
  0x2e   :  { %887 = vmatprep.subr.msk.mxu1 %vm294_vm1, %v48_v52  ;;  %667 = vperm.xlu0 %925, %v1124_v33  }
  0x30   :  { %848 = vmatpush3.xpose.msk.msra.mxu0 %vm96_vm0, %v68_v53  ;;  %671 = vperm.xlu1 %924, %v1143_v36  }
  0x31   :  { %888 = vmatpush3.xpose.msk.msra.mxu1 %vm294_vm1, %v32_v54  ;;  %849 = vmatprep.subr.msk.mxu0 %vm96_vm0, %v83_v55 }
  0x32   :  { %889 = vmatprep.subr.msk.mxu1 %vm294_vm1, %v47_v56  ;;  %926 = vset.pattern.permute.xlu0 %v953_v17 }
  0x33   :  { %707 = vperm.xlu0 %926, %v704_v16  }
  0x34   :  { %850 = vmatpush3.xpose.msk.msra.mxu0 %vm96_vm0, %v67_v57  ;;  %675 = vperm.xlu1 %924, %v1129_v34  }
  0x35   :  { %890 = vmatpush3.xpose.msk.msra.mxu1 %vm294_vm1, %v31_v58  ;;  %851 = vmatprep.subr.msk.mxu0 %vm96_vm0, %v82_v59 }
  0x36   :  { %891 = vmatprep.subr.msk.mxu1 %vm294_vm1, %v46_v60 }
  0x38   :  { %852 = vmatpush3.xpose.msk.msra.mxu0 %vm96_vm0, %v66_v61 }
  0x39   :  { %892 = vmatpush3.xpose.msk.msra.mxu1 %vm294_vm1, %v30_v62  ;;  %853 = vmatprep.subr.msk.mxu0 %vm96_vm0, %v81_v63  ;;  %v532_v62 = vld [vmem:[%s1353_s4] sm:$0xff]  ;;  %v534_v63 = vld [vmem:[%s1353_s4 + $0x10] sm:$0xff] }
  0x3a   :  { %893 = vmatprep.subr.msk.mxu1 %vm294_vm1, %v45_v0  ;;  %v533_v0 = vld [vmem:[%s1353_s4 + $0x8] sm:$0xff] }
  0x3c   :  { %854 = vmatpush3.xpose.msk.msra.mxu0 %vm96_vm0, %v65_v1  ;;  %v535_v1 = vld [vmem:[%s1353_s4 + $0x18] sm:$0xff]  ;;  %s955_s4 = smov [#allocation2]  }
  0x3d   :  { %894 = vmatpush3.xpose.msk.msra.mxu1 %vm294_vm1, %v29_v2  ;;  %855 = vmatprep.subr.msk.mxu0 %vm96_vm0, %v80_v3  ;;  %s741_s10 = sshll.u32 %s955_s4, 4  ;;  %s742_s10 = int_to_ptr.vmem [resolvable:$true] %s741_s10 }
  0x3e   :  { %895 = vmatprep.subr.msk.mxu1 %vm294_vm1, %v44_v4  ;;  %s927_s11 = scalar_lea.vmem %s742_s10, 32  ;;  %p932_p1 = scmp.lt.s32.totalorder %s742_s10, %s742_s10 }
  0x3f   :  { %p928_p0 = scmp.ne.s32.totalorder %s742_s10, %s927_s11  ;;  %p933_p2 = scmp.lt.s32.totalorder %s927_s11, %s927_s11 }
  0x40   :  { %856 = vmatpush3.xpose.msk.msra.mxu0 %vm96_vm0, %v64_v5 }
  0x41   :  { %896 = vmatpush3.xpose.msk.msra.mxu1 %vm294_vm1, %v28_v6  ;;  %p934_p3 = por %p933_p2, %p932_p1 }
  0x43   :  { %858 = vmatmul.mubr.msk.f32.vlgmr.msra.gmra.mxu0 %vm96_vm0, %v1094_v27  ;;  %p935_p4 = pnand %p934_p3, %p928_p0 }
  0x44   :  { %898 = vmatmul.mubr.msk.f32.vlgmr.msra.gmra.mxu1 %vm294_vm1, %v1099_v28  ;;  %859 = vmatprep.mubr.msk.f32.mxu0 %vm96_vm0, %v61_v7 }
  0x45   :  { %899 = vmatprep.mubr.msk.f32.mxu1 %vm294_vm1, %v25_v8 }
  0x47   :  { %860 = vmatmul.mubr.msk.f32.gmra.mxu0 %vm96_vm0, %v61_v7 }
  0x48   :  { %900 = vmatmul.mubr.msk.f32.gmra.mxu1 %vm294_vm1, %v25_v8  ;;  %861 = vmatprep.mubr.msk.f32.mxu0 %vm96_vm0, %v62_v9 }
  0x49   :  { %901 = vmatprep.mubr.msk.f32.mxu1 %vm294_vm1, %v26_v10 }
  0x4b   :  { %862 = vmatmul.mubr.msk.f32.gmra.mxu0 %vm96_vm0, %v62_v9 }
  0x4c   :  { %902 = vmatmul.mubr.msk.f32.gmra.mxu1 %vm294_vm1, %v26_v10  ;;  %863 = vmatprep.mubr.msk.f32.mxu0 %vm96_vm0, %v63_v11 }
  0x4d   :  { %903 = vmatprep.mubr.msk.f32.mxu1 %vm294_vm1, %v27_v12 }
  0x4f   :  { %864 = vmatmul.mubr.msk.f32.gmra.mxu0 %vm96_vm0, %v63_v11 }
  0x50   :  { %904 = vmatmul.mubr.msk.f32.gmra.mxu1 %vm294_vm1, %v27_v12  ;;  %629 = vmatprep.mubr.f32.mxu0 %v950_v13 }
  0x51   :  { %641 = vmatprep.mubr.f32.mxu1 %v950_v13 }
  0x86   :  { %v514_v28 = vpop.permute.xlu0 %513 }
  0x89   :  { %v504_v33 = vpop.permute.xlu1 %503 }
  0x97   :  { %v499_v49 = vpop.permute.xlu1 %498 }
  0x99   :  { %v509_v40 = vpop.permute.xlu0 %508 }
  0x9e   :  { %v542_v2 = vpop.permute.xlu1 %541  ;;  %v538_v4 = vpop.permute.xlu0 %537 }
  0xa2   :  { %v546_v3 = vpop.permute.xlu1 %545  ;;  %v550_v9 = vpop.permute.xlu0 %549 }
  0xa7   :  { %v664_v5 = vpop.permute.xlu1 %663 }
 0x103   :  { %v271_v18 = vpop.f32.mrf.mxu0 }
 0x104   :  { %v469_v19 = vpop.f32.mrf.mxu1 }
 0x105   :  { %v273_v20 = vpop.f32.mrf.mxu0  ;;  %v470_v47 = vadd.f32 %v469_v19, %v271_v18  ;;  %v668_v19 = vpop.permute.xlu0 %667 }
 0x106   :  { %v471_v21 = vpop.f32.mrf.mxu1 }
 0x107   :  { %v277_v22 = vpop.f32.mrf.mxu0  ;;  %v472_v44 = vadd.f32 %v471_v21, %v273_v20  ;;  %v516_v56 = vadd.f32 %v499_v49, %v470_v47  ;;  %v672_v20 = vpop.permute.xlu1 %671 }
 0x108   :  { %v475_v23 = vpop.f32.mrf.mxu1 }
 0x109   :  { %v279_v24 = vpop.f32.mrf.mxu0  ;;  %v476_v42 = vadd.f32 %v475_v23, %v277_v22  ;;  %v517_v54 = vadd.f32 %v499_v49, %v472_v44  ;;  %v524_v61 = vmax.f32 %v516_v56, 0.0 }
 0x10a   :  { %v477_v25 = vpop.f32.mrf.mxu1 }
 0x10b   :  { %v283_v26 = vpop.f32.mrf.mxu0  ;;  %v478_v39 = vadd.f32 %v477_v25, %v279_v24  ;;  %v518_v52 = vadd.f32 %v504_v33, %v476_v42  ;;  %v525_v60 = vmax.f32 %v517_v54, 0.0 }
 0x10c   :  { %v481_v27 = vpop.f32.mrf.mxu1 }
 0x10d   :  { %v285_v29 = vpop.f32.mrf.mxu0  ;;  %v482_v37 = vadd.f32 %v481_v27, %v283_v26  ;;  %v519_v50 = vadd.f32 %v504_v33, %v478_v39  ;;  %v526_v59 = vmax.f32 %v518_v52, 0.0  ;;  %v676_v39 = vpop.permute.xlu1 %675 }
 0x10e   :  { %v483_v30 = vpop.f32.mrf.mxu1 }
 0x10f   :  { %v289_v31 = vpop.f32.mrf.mxu0  ;;  %v484_v35 = vadd.f32 %v483_v30, %v285_v29  ;;  %v520_v48 = vadd.f32 %v509_v40, %v482_v37  ;;  %v527_v58 = vmax.f32 %v519_v50, 0.0 }
 0x110   :  { %v487_v32 = vpop.f32.mrf.mxu1 }
 0x111   :  { %v488_v36 = vadd.f32 %v487_v32, %v289_v31  ;;  %v291_v34 = vpop.f32.mrf.mxu0  ;;  %v521_v45 = vadd.f32 %v509_v40, %v484_v35  ;;  %v528_v57 = vmax.f32 %v520_v48, 0.0 }
 0x112   :  { %v489_v38 = vpop.f32.mrf.mxu1 }
 0x113   :  { %v490_v41 = vadd.f32 %v489_v38, %v291_v34  ;;  %v522_v43 = vadd.f32 %v514_v28, %v488_v36  ;;  %v529_v55 = vmax.f32 %v521_v45, 0.0 }
 0x115   :  { %v523_v46 = vadd.f32 %v514_v28, %v490_v41  ;;  %v530_v53 = vmax.f32 %v522_v43, 0.0 }
 0x117   :  { %v531_v51 = vmax.f32 %v523_v46, 0.0 }
 0x119   :  { %589 = vmatprep.subr.mxu0 %v531_v51  ;;  %905 = vmatprep.subr.mxu1 %v531_v51 }
 0x11a   :  { %590 = vmatpush1.msra.mxu0 %v530_v53  ;;  %909 = vmatpush1.msra.mxu1 %v530_v53  ;;  %v954_v53 = vmov 1966171168  }
 0x11b   :  { %591 = vmatprep.subr.mxu0 %v529_v55  ;;  %906 = vmatprep.subr.mxu1 %v529_v55  ;;  %v716_v54 = vunpack.c.l.s4 %v954_v53  ;;  %v718_v55 = vlaneseq }
 0x11c   :  { %592 = vmatpush1.msra.mxu0 %v528_v57  ;;  %910 = vmatpush1.msra.mxu1 %v528_v57 }
 0x11d   :  { %593 = vmatprep.subr.mxu0 %v527_v58  ;;  %907 = vmatprep.subr.mxu1 %v527_v58  ;;  %vm732_vm3 = vcmp.lt.s32.totalorder %v718_v55, 256 }
 0x11e   :  { %594 = vmatpush1.msra.mxu0 %v526_v59  ;;  %911 = vmatpush1.msra.mxu1 %v526_v59 }
 0x11f   :  { %595 = vmatprep.subr.mxu0 %v525_v60  ;;  %908 = vmatprep.subr.mxu1 %v525_v60  ;;  %v717_v60 = vunpack.c.0.s8 %v716_v54 }
 0x120   :  { %596 = vmatpush1.msra.mxu0 %v524_v61  ;;  %912 = vmatpush1.msra.mxu1 %v524_v61  ;;  %v719_v61 = vshrl.u32 %v718_v55, 7 }
 0x121   :  { %821 = vmatmul.mubr.msk.f32.vlgmr.msra.gmra.mxu0 %vm552_vm2, %v532_v62  ;;  %823 = vmatmul.mubr.msk.f32.vlgmr.msra.gmra.mxu1 %vm552_vm2, %v534_v63 }
 0x122   :  { %635 = vmatprep.mubr.f32.mxu0 %v950_v13  ;;  %647 = vmatprep.mubr.f32.mxu1 %v950_v13 }
 0x125   :  { %822 = vmatmul.mubr.msk.f32.gmra.mxu0 %vm552_vm2, %v533_v0  ;;  %824 = vmatmul.mubr.msk.f32.gmra.mxu1 %vm552_vm2, %v535_v1  ;;  %v708_v0 = vpop.permute.xlu0 %707 }
 0x1e1   :  { %v631_v6 = vpop.f32.mrf.mxu0  ;;  %v643_v7 = vpop.f32.mrf.mxu1 }
 0x1e2   :  { %v632_v8 = vadd.f32 %v631_v6, %v538_v4  ;;  %v644_v11 = vadd.f32 %v643_v7, %v546_v3 }
 0x1e3   :  { %v633_v10 = vpop.f32.mrf.mxu0  ;;  %v645_v12 = vpop.f32.mrf.mxu1 }
 0x1e4   :  { %v634_v14 = vadd.f32 %v633_v10, %v538_v4  ;;  %v654_v15 = vmax.f32 %v632_v8, 0.0  ;;  %v646_v18 = vadd.f32 %v645_v12, %v546_v3  ;;  %v658_v21 = vmax.f32 %v644_v11, 0.0 }
 0x1e5   :  { %v637_v13 = vpop.f32.mrf.mxu0  ;;  %v649_v16 = vpop.f32.mrf.mxu1 }
 0x1e6   :  { %v638_v17 = vadd.f32 %v637_v13, %v542_v2  ;;  %v650_v23 = vadd.f32 %v649_v16, %v550_v9  ;;  %v655_v25 = vmax.f32 %v634_v14, 0.0  ;;  %v678_v28 = vmul.f32 %v664_v5, %v654_v15 }
 0x1e7   :  { %v639_v22 = vpop.f32.mrf.mxu0  ;;  %v651_v24 = vpop.f32.mrf.mxu1  ;;  %v659_v31 = vmax.f32 %v646_v18, 0.0  ;;  %v682_v35 = vmul.f32 %v672_v20, %v658_v21 }
 0x1e8   :  { %v656_v26 = vmax.f32 %v638_v17, 0.0  ;;  %v640_v27 = vadd.f32 %v639_v22, %v542_v2  ;;  %v652_v29 = vadd.f32 %v651_v24, %v550_v9  ;;  %v660_v33 = vmax.f32 %v650_v23, 0.0 }
 0x1e9   :  { %v679_v36 = vmul.f32 %v664_v5, %v655_v25  ;;  %v683_v41 = vmul.f32 %v672_v20, %v659_v31  ;;  %v720_v2 = vsub.s32 %v717_v60, %v719_v61 }
 0x1ea   :  { %v657_v30 = vmax.f32 %v640_v27, 0.0  ;;  %v680_v32 = vmul.f32 %v668_v19, %v656_v26  ;;  %v661_v38 = vmax.f32 %v652_v29, 0.0  ;;  %v684_v43 = vmul.f32 %v676_v39, %v660_v33 }
 0x1ec   :  { %v681_v37 = vmul.f32 %v668_v19, %v657_v30  ;;  %v686_v34 = vadd.f32 %v680_v32, %v678_v28  ;;  %v685_v45 = vmul.f32 %v676_v39, %v661_v38 }
 0x1ee   :  { %v695_v40 = vadd.f32 %v681_v37, %v679_v36  ;;  %v687_v42 = vadd.f32 %v686_v34, %v682_v35 }
 0x1f0   :  { %v696_v44 = vadd.f32 %v695_v40, %v683_v41  ;;  %v688_v46 = vadd.f32 %v687_v42, %v684_v43 }
 0x1f2   :  { %v689_v47 = vrot.slane %v688_v46, 4  ;;  %v697_v48 = vadd.f32 %v696_v44, %v685_v45 }
 0x1f4   :  { %v690_v49 = vadd.f32 %v689_v47, %v688_v46  ;;  %v698_v50 = vrot.slane %v697_v48, 4 }
 0x1f6   :  { %v699_v51 = vadd.f32 %v698_v50, %v697_v48  ;;  %v691_v52 = vrot.slane %v690_v49, 2 }
 0x1f8   :  { %v692_v56 = vadd.f32 %v691_v52, %v690_v49  ;;  %v700_v57 = vrot.slane %v699_v51, 2 }
 0x1fa   :  { %v693_v58 = vrot.slane %v692_v56, 1  ;;  %v701_v59 = vadd.f32 %v700_v57, %v699_v51 }
 0x1fc   :  { %v694_v62 = vadd.f32 %v693_v58, %v692_v56  ;;  %v702_v63 = vrot.slane %v701_v59, 1 }
 0x1fe   :  { %v703_v1 = vadd.f32 %v702_v63, %v701_v59  ;;  %v710_v3 = vadd.f32 %v708_v0, %v694_v62 }
 0x200   :  { %v711_v4 = vadd.f32 %v708_v0, %v703_v1 }
 0x202   :  { %v714_v5 = vcombine.low %v710_v3, %v711_v4 }
 0x204   :  { %v721_v6 = vrot.slane %v714_v5, %v720_v2 }
 0x206   :  { %v728_v7 = vrot.slane %v721_v6, %v720_v2 }
 0x208   :  { %734 = vst.msk [vmem:[#allocation2] sm:$0x3] %vm732_vm3, %v728_v7 }
 0x209   :  { %938 = shalt.err (!%p935_p4)
}
 0x20a   :  { %744 = dma.vmem_to_hbm [thread:$0]  %s742_s10, 32, %s1355_s6, [#allocation3]  }
 0x20b   :  { %947 = dma.done.wait [#allocation3], 32  }
 0x20c   :  { %948 = vsyncadd [#allocation3], 4294967264 }
 0x20d   :  { %748 = vsyncpa [#allocation3], 1 }

</bundles_post_ra>
